<compile_context>
chip_gen: v5e
topology: v5e:2x2
jax: 0.10.0
libtpu: 0.0.40
codegen_flags: <defaults>
</compile_context>

<pallas_src>
import functools
import math

import jax
import jax.numpy as jnp
from jax.experimental import pallas as pl
from jax.experimental.pallas import tpu as pltpu


# ----------------------------------------------------------------------------
# Pallas kernel: tiled GEMM (conv-as-GEMM), f32 accumulator, bias folded into
# the accumulator init, optionally VMEM-resident weight slab.
# ----------------------------------------------------------------------------
def hs_conv_gemm_kernel(p_ref, w_ref, b_ref, o_ref, acc_ref, *, w_resident):
    # p_ref  : (TM, TK)           bf16 im2col patches tile
    # w_ref  : (k_tiles, TK, TN)  bf16 resident weight slab   (w_resident=True)
    #          (TK, TN)           bf16 streamed weight tile   (otherwise)
    # b_ref  : (1, TN)            f32 reduced bias tile
    # o_ref  : (TM, TN)           f32 output tile
    # acc_ref: (TM, TN)           f32 VMEM accumulator, resident across K axis
    k = pl.program_id(2)

    @pl.when(k == 0)
    def _():
        # Bias folded into the accumulator init (no epilogue add needed).
        acc_ref[...] = jnp.broadcast_to(b_ref[...], acc_ref.shape)

    w_tile = w_ref[k] if w_resident else w_ref[...]
    acc_ref[...] += jnp.dot(p_ref[...], w_tile,
                            preferred_element_type=jnp.float32)

    @pl.when(k == pl.num_programs(2) - 1)
    def _():
        o_ref[...] = acc_ref[...].astype(o_ref.dtype)


def _round_up(x, m):
    return (x + m - 1) // m * m


def _select_tiles(M, K, O, *, tm_max=1024, tn_max=512, tk_max=512,
                  vmem_budget=40 << 20, w_resident_budget=12 << 20):
    """Pick (TM, TK, TN), padded sizes, residency and a VMEM limit."""
    # --- N (output channels): tile O so per-step VMEM stays bounded. ---------
    O128 = _round_up(O, 128)
    if O128 <= tn_max:
        TN, O_pad = O128, O128
    else:
        best = None
        for cand in (512, 384, 256):          # minimize padding, prefer wide TN
            opad = _round_up(O128, cand)
            key = (opad, -cand)
            if best is None or key < best[0]:
                best = (key, cand, opad)
        TN, O_pad = best[1], best[2]
    n_tiles = O_pad // TN

    # --- K (contraction): never fall back to TK=128 when K is large. ---------
    if K <= tk_max:
        K_pad = _round_up(K, 128)
        TK = K_pad                             # single K step
    else:
        K_pad = _round_up(K, tk_max)
        TK = tk_max
    k_tiles = K_pad // TK

    # Keep the full-K weight slab VMEM-resident across the whole M loop when it
    # fits: weight HBM traffic == weight size (read once per N tile).
    w_resident = (2 * K_pad * TN * 2) <= w_resident_budget

    # --- M (patches rows): multiple of 16 (bf16 sublane packing); guarantee
    # >= 2 parallel grid steps so v7x's two TensorCores both get work. --------
    M16 = _round_up(M, 16)
    if M16 <= tm_max:
        if n_tiles >= 2 or M16 < 32:
            TM, M_pad = M16, M16
        else:
            TM = _round_up(-(-M // 2), 16)     # split M in two parallel tiles
            M_pad = _round_up(M, TM)
    else:
        TM = tm_max
        M_pad = _round_up(M, tm_max)
    m_tiles = M_pad // TM

    # --- VMEM/step estimate + budget enforcement ------------------------------
    def est(tm, resident):
        return (2 * tm * TK * 2                               # patches, 2 bufs
                + 2 * (K_pad if resident else TK) * TN * 2    # weight
                + 2 * TN * 4                                  # bias
                + 2 * tm * TN * 4                             # output, 2 bufs
                + tm * TN * 4)                                # f32 accumulator

    while est(TM, w_resident) > vmem_budget and TM > 256:
        TM = max(16, _round_up(TM // 2, 16))
        M_pad = _round_up(M, TM)
        m_tiles = M_pad // TM
    if est(TM, w_resident) > vmem_budget:
        w_resident = False

    vmem_limit = int(min(max(2 * est(TM, w_resident), 32 << 20), 48 << 20))

    return dict(TM=TM, TK=TK, TN=TN, M_pad=M_pad, K_pad=K_pad, O_pad=O_pad,
                m_tiles=m_tiles, k_tiles=k_tiles, n_tiles=n_tiles,
                w_resident=w_resident, vmem_limit=vmem_limit)


def horseshoe_conv_matmul(patches, w_mean, b_mean, *, tm_max=1024, tn_max=512):
    """patches (M, K) bf16, w_mean (K, O) f32, b_mean (O,) f32 -> (M, O) f32."""
    M, K = patches.shape
    K2, O = w_mean.shape
    assert K == K2
    cfg = _select_tiles(M, K, O, tm_max=tm_max, tn_max=tn_max)
    TM, TK, TN = cfg["TM"], cfg["TK"], cfg["TN"]
    M_pad, K_pad, O_pad = cfg["M_pad"], cfg["K_pad"], cfg["O_pad"]
    m_tiles, k_tiles, n_tiles = cfg["m_tiles"], cfg["k_tiles"], cfg["n_tiles"]
    w_resident = cfg["w_resident"]

    # Zero-pad to lane-dense / MXU-friendly shapes (bf16 operands, f32 bias).
    patches_p = jnp.pad(patches, ((0, M_pad - M), (0, K_pad - K)))
    w_p = jnp.pad(w_mean, ((0, K_pad - K), (0, O_pad - O))).astype(jnp.bfloat16)
    b_p = jnp.pad(b_mean, (0, O_pad - O)).astype(jnp.float32).reshape(1, O_pad)

    if w_resident:
        # Full-K slab, index_map depends only on the N tile -> DMA'd once per
        # N tile and stays VMEM-resident across the entire M loop.
        w_arg = w_p.reshape(k_tiles, TK, O_pad)
        w_spec = pl.BlockSpec((k_tiles, TK, TN), lambda j, i, k: (0, 0, j))
    else:
        w_arg = w_p
        w_spec = pl.BlockSpec((TK, TN), lambda j, i, k: (k, j))

    kernel = functools.partial(hs_conv_gemm_kernel, w_resident=w_resident)

    out_pad = pl.pallas_call(
        kernel,
        out_shape=jax.ShapeDtypeStruct((M_pad, O_pad), jnp.float32),
        grid_spec=pltpu.PrefetchScalarGridSpec(
            num_scalar_prefetch=0,
            # (j, i, k): N tiles outermost (weight residency), K innermost
            # reduction; j and i are both "parallel" for megacore sharding.
            grid=(n_tiles, m_tiles, k_tiles),
            in_specs=[
                pl.BlockSpec((TM, TK), lambda j, i, k: (i, k)),   # patches
                w_spec,                                           # weight
                pl.BlockSpec((1, TN), lambda j, i, k: (0, j)),    # bias
            ],
            out_specs=pl.BlockSpec((TM, TN), lambda j, i, k: (i, j)),
            scratch_shapes=[pltpu.VMEM((TM, TN), jnp.float32)],
        ),
        compiler_params=pltpu.CompilerParams(
            dimension_semantics=("parallel", "parallel", "arbitrary"),
            vmem_limit_bytes=cfg["vmem_limit"]),
    )(patches_p, w_arg, b_p)

    return out_pad[:M, :O]


# ----------------------------------------------------------------------------
# Glue: parameter init, reparametrized sampling, im2col, layout transforms.
# ----------------------------------------------------------------------------
def im2col(x, kh, kw, stride=1, padding=0, dilation=(1, 1)):
    # x: (B, C, H, W); returns (B*OH*OW, C*KH*KW) in x.dtype (bf16 here, so the
    # patches array is materialized directly in the MXU operand dtype).
    B, C, H, W = x.shape
    sh = sw = stride
    ph = pw = padding
    dh, dw = dilation
    x = jnp.pad(x, ((0, 0), (0, 0), (ph, ph), (pw, pw)))
    Hp, Wp = H + 2 * ph, W + 2 * pw
    OH = (Hp - dh * (kh - 1) - 1) // sh + 1
    OW = (Wp - dw * (kw - 1) - 1) // sw + 1
    cols = []
    for i in range(kh):
        for j in range(kw):
            sl = x[:, :, i * dh: i * dh + sh * (OH - 1) + 1: sh,
                         j * dw: j * dw + sw * (OW - 1) + 1: sw]
            cols.append(sl)                                   # (B, C, OH, OW)
    patches = jnp.stack(cols, axis=2)                         # (B, C, KH*KW, OH, OW)
    patches = patches.reshape(B, C * kh * kw, OH, OW)
    patches = patches.transpose(0, 2, 3, 1).reshape(B * OH * OW, C * kh * kw)
    return patches, OH, OW


def make_params(key, in_features, out_features, kernel_size, priors):
    kh, kw = kernel_size
    scale = (1.0 * math.sqrt(6.0 / (in_features + out_features))
             if priors["horseshoe_scale"] is None else priors["horseshoe_scale"])
    prior_lambda_rate = 1.0 / priors["weight_cauchy_scale"] ** 2
    prior_theta_rate = 1.0 / priors["global_cauchy_scale"] ** 2

    ks = jax.random.split(key, 4)
    beta_mean = jax.random.uniform(ks[0], (out_features, in_features, kh, kw),
                                   minval=-scale, maxval=scale, dtype=jnp.float32)
    beta_rho = jnp.full((out_features, in_features, kh, kw),
                        priors["beta_rho_scale"], jnp.float32)
    # log_tau_mean = log(HalfCauchy(1/sqrt(prior_lambda_rate)) sample)
    hc_tau = jnp.abs(jax.random.cauchy(ks[1], (in_features, kh, kw), jnp.float32)
                     ) / math.sqrt(prior_lambda_rate) + 1e-6
    log_tau_mean = jnp.log(hc_tau)
    log_tau_rho = jnp.full((in_features, kh, kw), priors["log_tau_rho_scale"], jnp.float32)
    # log_v_mean = log(HalfCauchy(1/sqrt(prior_theta_rate)) sample)
    hc_v = jnp.abs(jax.random.cauchy(ks[2], (1, kh, kw), jnp.float32)
                   ) / math.sqrt(prior_theta_rate) + 1e-6
    log_v_mean = jnp.log(hc_v)
    log_v_rho = jnp.full((1, kh, kw), priors["log_v_rho_scale"], jnp.float32)
    bias_mean = jnp.zeros((out_features,), jnp.float32)
    bias_rho = jnp.full((out_features,), priors["bias_rho_scale"], jnp.float32)
    return dict(beta_mean=beta_mean, beta_rho=beta_rho,
                log_tau_mean=log_tau_mean, log_tau_rho=log_tau_rho,
                log_v_mean=log_v_mean, log_v_rho=log_v_rho,
                bias_mean=bias_mean, bias_rho=bias_rho)


def horseshoe_conv_forward(params, x, key, n_samples=1,
                           stride=1, padding=0, dilation=(1, 1)):
    """Forward pass of HorseshoeConvLayer (conv2d) with a Pallas hot path."""
    O, C, KH, KW = params["beta_mean"].shape
    B = x.shape[0]
    S = n_samples
    k1, k2, k3, k4 = jax.random.split(key, 4)

    sp = jax.nn.softplus  # numerically safe softplus (no exp overflow)

    # Reparametrized Gaussian samples (mean + softplus(rho) * eps).
    beta_s = params["beta_mean"] + sp(params["beta_rho"]) * \
        jax.random.normal(k1, (S, O, C, KH, KW), jnp.float32)          # (S,O,C,KH,KW)
    tau_s = params["log_tau_mean"] + sp(params["log_tau_rho"]) * \
        jax.random.normal(k2, (S, C, KH, KW), jnp.float32)             # (S,C,KH,KW)
    v_s = params["log_v_mean"] + sp(params["log_v_rho"]) * \
        jax.random.normal(k3, (S, 1, KH, KW), jnp.float32)             # (S,1,KH,KW)
    bias_s = params["bias_mean"] + sp(params["bias_rho"]) * \
        jax.random.normal(k4, (S, O), jnp.float32)                     # (S,O)

    # weight = beta * unsqueeze(log_tau, 1) * unsqueeze(log_v, 1); mean over
    # samples is hoisted out of the kernel (shrinks HBM traffic by a factor S).
    w_samples = beta_s * tau_s[:, None] * v_s[:, None]                 # (S,O,C,KH,KW)
    w_mean_oihw = jnp.mean(w_samples, axis=0)                          # (O,C,KH,KW)
    b_mean = jnp.mean(bias_s, axis=0)                                  # (O,)
    w_mean = w_mean_oihw.reshape(O, C * KH * KW).T                     # (K, O)

    # im2col in bf16 (MXU operand dtype folded into the patches materialization),
    # then conv == GEMM in the Pallas kernel (f32 accumulation).
    patches, OH, OW = im2col(x.astype(jnp.bfloat16), KH, KW,
                             stride, padding, dilation)                # (B*OH*OW, K)
    out = horseshoe_conv_matmul(patches, w_mean, b_mean)               # (B*OH*OW, O)
    # Keep NCHW for parity with the PyTorch layer (consumer could take NHWC
    # directly and skip this transpose).
    out = out.reshape(B, OH, OW, O).transpose(0, 3, 1, 2)
    return out, w_mean_oihw, b_mean


# ----------------------------------------------------------------------------
# Main
# ----------------------------------------------------------------------------
if __name__ == "__main__":
    priors = {
        "horseshoe_scale": None,
        "weight_cauchy_scale": 1.0,
        "global_cauchy_scale": 1.0,
        "beta_rho_scale": -5.0,
        "log_tau_mean": None,
        "log_tau_rho_scale": -5.0,
        "bias_rho_scale": -5.0,
        "log_v_mean": None,
        "log_v_rho_scale": -5.0,
    }

    B, C, H, W = 2, 4, 16, 16
    O, KH, KW = 8, 3, 3
    n_samples = 1

    root = jax.random.PRNGKey(0)
    k_param, k_x, k_sample = jax.random.split(root, 3)

    params = make_params(k_param, C, O, (KH, KW), priors)
    x = jax.random.normal(k_x, (B, C, H, W), jnp.float32)

    out, w_mean, b_mean = horseshoe_conv_forward(params, x, k_sample,
                                                 n_samples=n_samples)
    out = jax.block_until_ready(out)

    # Reference: XLA conv with the same bf16-quantized, f32-accumulated
    # sampled-mean weight/bias, so the only difference is accumulation order.
    # (The kernel intentionally uses bf16 MXU operands; tighten to f32 operands
    # if bit-parity with the f32 PyTorch layer is required.)
    ref = jax.lax.conv_general_dilated(
        x.astype(jnp.bfloat16), w_mean.astype(jnp.bfloat16),
        window_strides=(1, 1), padding="VALID",
        dimension_numbers=("NCHW", "OIHW", "NCHW"),
        preferred_element_type=jnp.float32)
    ref = ref + b_mean[None, :, None, None]

    assert out.shape == (B, O, H - KH + 1, W - KW + 1)
    assert jnp.allclose(out, ref, atol=1e-2, rtol=1e-2)
    print("KERNEL_OK")
</pallas_src>

<mosaic_0001>
module attributes {stable_mosaic.version = 11 : i64} {
  func.func @hs_conv_gemm_kernel(%arg0: i32, %arg1: i32, %arg2: i32, %arg3: memref<208x128xbf16, #tpu.memory_space<vmem>>, %arg4: memref<1x128x128xbf16, #tpu.memory_space<vmem>>, %arg5: memref<1x128xf32, #tpu.memory_space<vmem>>, %arg6: memref<208x128xf32, #tpu.memory_space<vmem>>, %arg7: memref<208x128xf32, #tpu.memory_space<vmem>>) attributes {dimension_semantics = [#tpu.dimension_semantics<parallel>, #tpu.dimension_semantics<parallel>, #tpu.dimension_semantics<arbitrary>], iteration_bounds = array<i64: 1, 2, 1>, scalar_prefetch = 0 : i64, scratch_operands = 1 : i64, tpu.core_type = #tpu.core_type<tc>, window_params = [{transform_indices = @transform_0, window_bounds = array<i64: 208, 128>}, {transform_indices = @transform_1, window_bounds = array<i64: 1, 128, 128>}, {transform_indices = @transform_2, window_bounds = array<i64: 1, 128>}, {transform_indices = @transform_3, window_bounds = array<i64: 208, 128>}]} {
    %c0_i32 = arith.constant 0 : i32
    %0 = arith.cmpi eq, %arg2, %c0_i32 : i32
    %1 = arith.extui %0 : i1 to i32
    %c0_i32_0 = arith.constant 0 : i32
    %2 = arith.cmpi ne, %1, %c0_i32_0 : i32
    scf.if %2 {
      %c0_10 = arith.constant 0 : index
      %c0_11 = arith.constant 0 : index
      %14 = vector.load %arg5[%c0_10, %c0_11] : memref<1x128xf32, #tpu.memory_space<vmem>>, vector<1x128xf32>
      %15 = vector.shape_cast %14 : vector<1x128xf32> to vector<1x128xf32>
      %16 = vector.broadcast %15 : vector<1x128xf32> to vector<208x128xf32>
      %c0_12 = arith.constant 0 : index
      %c0_13 = arith.constant 0 : index
      %17 = vector.load %arg7[%c0_12, %c0_13] : memref<208x128xf32, #tpu.memory_space<vmem>>, vector<208x128xf32>
      tpu.vector_store %arg7[%c0_12, %c0_13], %16 {strides = array<i32>} : memref<208x128xf32, #tpu.memory_space<vmem>>, vector<208x128xf32>,
    } else {
    }
    %3 = arith.index_cast %arg2 : i32 to index
    %c0 = arith.constant 0 : index
    %c0_1 = arith.constant 0 : index
    %4 = vector.load %arg4[%3, %c0, %c0_1] : memref<1x128x128xbf16, #tpu.memory_space<vmem>>, vector<1x128x128xbf16>
    %5 = vector.shape_cast %4 : vector<1x128x128xbf16> to vector<128x128xbf16>
    %c0_2 = arith.constant 0 : index
    %c0_3 = arith.constant 0 : index
    %6 = vector.load %arg7[%c0_2, %c0_3] : memref<208x128xf32, #tpu.memory_space<vmem>>, vector<208x128xf32>
    %c0_4 = arith.constant 0 : index
    %c0_5 = arith.constant 0 : index
    %7 = vector.load %arg3[%c0_4, %c0_5] : memref<208x128xbf16, #tpu.memory_space<vmem>>, vector<208x128xbf16>
    %cst = arith.constant dense<0.000000e+00> : vector<208x128xf32>
    %8 = tpu.matmul %7, %5, %cst {dimension_numbers = #tpu.dot_dimension_numbers<[1], [0], [0], [1], [0, 0, 1, 1], [], []>} : vector<208x128xbf16>, vector<128x128xbf16>, vector<208x128xf32> -> vector<208x128xf32>
    %9 = arith.addf %6, %8 : vector<208x128xf32>
    %c0_6 = arith.constant 0 : index
    %c0_7 = arith.constant 0 : index
    %10 = vector.load %arg7[%c0_6, %c0_7] : memref<208x128xf32, #tpu.memory_space<vmem>>, vector<208x128xf32>
    tpu.vector_store %arg7[%c0_6, %c0_7], %9 {strides = array<i32>} : memref<208x128xf32, #tpu.memory_space<vmem>>, vector<208x128xf32>,
    %c0_i32_8 = arith.constant 0 : i32
    %11 = arith.cmpi eq, %arg2, %c0_i32_8 : i32
    %12 = arith.extui %11 : i1 to i32
    %c0_i32_9 = arith.constant 0 : i32
    %13 = arith.cmpi ne, %12, %c0_i32_9 : i32
    scf.if %13 {
      %c0_10 = arith.constant 0 : index
      %c0_11 = arith.constant 0 : index
      %14 = vector.load %arg7[%c0_10, %c0_11] : memref<208x128xf32, #tpu.memory_space<vmem>>, vector<208x128xf32>
      %c0_12 = arith.constant 0 : index
      %c0_13 = arith.constant 0 : index
      %15 = vector.load %arg6[%c0_12, %c0_13] : memref<208x128xf32, #tpu.memory_space<vmem>>, vector<208x128xf32>
      tpu.vector_store %arg6[%c0_12, %c0_13], %14 {strides = array<i32>} : memref<208x128xf32, #tpu.memory_space<vmem>>, vector<208x128xf32>,
    } else {
    }
    return
  }
  func.func @transform_0(%arg0: i32, %arg1: i32, %arg2: i32) -> (i32, i32) {
    %c0_i32 = arith.constant 0 : i32
    return %arg1, %arg2 : i32, i32
  }
  func.func @transform_1(%arg0: i32, %arg1: i32, %arg2: i32) -> (i32, i32, i32) {
    %c0_i32 = arith.constant 0 : i32
    %c0_i32_0 = arith.constant 0 : i32
    %c0_i32_1 = arith.constant 0 : i32
    return %c0_i32, %c0_i32_0, %arg0 : i32, i32, i32
  }
  func.func @transform_2(%arg0: i32, %arg1: i32, %arg2: i32) -> (i32, i32) {
    %c0_i32 = arith.constant 0 : i32
    %c0_i32_0 = arith.constant 0 : i32
    return %c0_i32, %arg0 : i32, i32
  }
  func.func @transform_3(%arg0: i32, %arg1: i32, %arg2: i32) -> (i32, i32) {
    %c0_i32 = arith.constant 0 : i32
    return %arg1, %arg0 : i32, i32
  }
}

</mosaic_0001>

<bundles_post_ra>
// kernel: tpu_custom_call.1
= control target key start
LH: loop header
LB: loop body
LE: loop exit
PB: predicated region body
PF: predicated region fallthrough
CT: control target
= control target key end

     0   :  { %8 = vsyncpa [#allocation4], 0  ;;  %s1420_s0 = inlined_call_operand.hbm [shape: bf16[416,128], index: 0, kind: input, shape index: {}]   ;;  %s1421_s1 = inlined_call_operand.hbm [shape: bf16[1,128,128], index: 1, kind: input, shape index: {}]   ;;  %s1422_s2 = inlined_call_operand.vmem [shape: f32[1,128], index: 2, kind: input, shape index: {}]   ;;  %s1423_s3 = inlined_call_operand.hbm [shape: f32[416,128], index: 3, kind: output, shape index: {}]  }
   0x1   :  { %10 = vsyncpa [#allocation4 + $0x1], 0 }
   0x2   :  { %11 = vsyncpa [#allocation7], 0 }
   0x3   :  { %12 = vsyncpa [#allocation5], 0 }
   0x4   :  { %14 = vsyncpa [#allocation5 + $0x1], 0  ;;  %s1195_s12 = smov 0   ;;  %s1197_s13 = smov 0  }
   0x5   :  { %s1199_s14 = smov 0   ;;  %s1201_s15 = smov 0  }
   0x6   :  { %s1203_s16 = smov 0   ;;  %s1205_s17 = smov 0  }
   0x7 LB: > { %s798_s18 = sadd.s32 4294967295, %s1168_s17   ;;  %s799_s19 = sadd.s32 4294967294, %s1168_s17   ;;  %s1168_s17 = sphi %s1205_s17, %s20_s17   ;;  %s1164_s16 = sphi %s1203_s16, %s1434_s16   ;;  %s1160_s15 = sphi %s1201_s15, %s1433_s15   ;;  %s1156_s14 = sphi %s1199_s14, %s1432_s14   ;;  %s1152_s13 = sphi %s1197_s13, %s1431_s13   ;;  %s1148_s12 = sphi %s1195_s12, %s1430_s12  }
   0x8   : > { %p61_p0 = scmp.ne.s32.totalorder %s1152_s13, %s1148_s12  ;;  %p1229_p1 = scmp.eq.s32.totalorder %s798_s18, 0 }
   0x9   : > { %p1233_p2 = scmp.eq.s32.totalorder %s798_s18, 1  ;;  %p145_p3 = scmp.eq.s32.totalorder %s799_s19, 1 }
   0xa   : > { %p1239_p4 = por %p1229_p1, %p61_p0  ;;  %p800_p5 = scmp.ge.s32.totalorder %s1168_s17, 1 }
   0xb   : > { %p1244_p6 = por %p145_p3, %p61_p0  ;;  %p152_p7 = scmp.lt.s32.totalorder %s1168_s17, 3 }
   0xc   : > { %s165_s26 = sshll.u32 %s1421_s1, 4  ;;  %s1170_s28 = smov [#allocation6]   ;;  %s166_s26 = int_to_ptr.hbm [resolvable:$true] %s165_s26 }
   0xd   : > { %p1252_p8 = pnand %p800_p5, %p152_p7  ;;  %s167_s29 = sshll.u32 %s1170_s28, 4  ;;  %s168_s29 = int_to_ptr.vmem [resolvable:$true] %s167_s29 }
   0xe   : > { %p803_p11 = scmp.ge.s32.totalorder %s1168_s17, 2  ;;  %s1171_s30 = smov 64  }
   0xf   : > { %p952_p9 = pneg %p1252_p8  ;;  %s1172_s4 = smov 4  }
  0x10   : > { %s35_s5 = sadd.s32 1, %s1164_s16  ;;  %s48_s6 = sadd.s32 1, %s1156_s14 }
  0x11   : > { %p953_p10 = pnand %p952_p9, %p1229_p1  ;;  %p37_p12 = scmp.ge.s32.totalorder %s35_s5, 2 }
  0x12   : > { %p55_p13 = scmp.ne.s32.totalorder %s1156_s14, %s1152_s13  ;;  %p56_p0 = scmp.eq.s32.totalorder %s1168_s17, 0 }
  0x13   : > { %955 = dma.hbm_to_vmem [thread:$0]  (!%p953_p10), %s166_s26, 1024, %s168_s29, [#allocation7], %s1171_s30, %s1171_s30, %s1172_s4  }
  0x14   : > { %s1436_s5 = smov (%p37_p12, %s35_s5), 0  ;;  %p57_p3 = por %p56_p0, %p55_p13 }
  0x15   : > { %p1273_p5 = por %p1233_p2, %p55_p13  ;;  %s43_s8 = ssub.s32 %s1164_s16, %s1436_s5 }
  0x16   : > { %p965_p7 = scmp.lt.s32.totalorder %s1168_s17, 2  ;;  %p46_p9 = scmp.eq.s32.totalorder %s43_s8, 0 }
  0x17   : > { %s187_s9 = sand.u32 1, %s1156_s14   ;;  %s894_s18 = smul.u32 104, %s1164_s16 }
  0x18   : > { %s941_s10 = smul.u32 104, %s187_s9  ;;  %p957_p10 = pnand %p965_p7, %p57_p3 }
  0x19   : > { %s1282_s11 = scalar_select %p46_p9, %s1156_s14, %s48_s6  }
  0x1a   : > { %s191_s19 = scalar_lea.vmem [#allocation3], %s941_s10  ;;  %s197_s28 = scalar_lea.hbm %s1420_s0, %s894_s18 }
  0x1b   : > { %s200_s24 = sshll.u32 %s191_s19, 4  ;;  %s198_s21 = sshll.u32 %s197_s28, 4  ;;  %s201_s24 = int_to_ptr.vmem [resolvable:$true] %s200_s24  ;;  %s199_s21 = int_to_ptr.hbm [resolvable:$true] %s198_s21 }
  0x1c   : > { %s188_s29 = scalar_lea.sflag [#allocation4], %s187_s9  ;;  %212 = sbr.rel (%p1252_p8) target bundleno = 263 (0x107), region = 32 }
  0x1d   : > { %959 = dma.hbm_to_vmem [thread:$0]  (!%p957_p10), %s199_s21, 1664, %s201_s24, %s188_s29, %s1171_s30, %s1171_s30, %s1172_s4  }
  0x1e   : > { %s1294_s6 = sand.u32 (!%p1252_p8), 1, %s1152_s13  }
  0x1f   : > { %s942_s8 = smul.u32 (!%p1252_p8), 104, %s1294_s6  ;;  %s215_s10 = scalar_lea.sflag (!%p1252_p8), [#allocation4], %s1294_s6 }
  0x21   : > { %s1298_s18 = scalar_lea.vmem [#allocation3], %s942_s8 }
  0x22   : > { %1135 = dma.done.wait (%p1239_p4), %s215_s10, 1664  }
  0x23   : > { %1137 = vsyncadd (%p1239_p4), %s215_s10, 4294965632 }
  0x24   : > { %1139 = dma.done.wait (%p1229_p1), [#allocation7], 1024  }
  0x25   : > { %1141 = vsyncadd (%p1229_p1), [#allocation7], 4294966272  ;;  %v902_v0 = vld [vmem:[#allocation6 + $0x38] sm:$0xff]  ;;  %v901_v1 = vld [vmem:[#allocation6 + $0x30] sm:$0xff]  ;;  %s943_s20 = smul.u32 208, %s1294_s6  ;;  %s668_s28 = scalar_lea.sflag [#allocation5], %s1294_s6 }
  0x26   : > { %918 = vmatpush.bf16.msra.mxu2 %v902_v0  ;;  %919 = vmatpush.bf16.msra.mxu3 %v902_v0  ;;  %v900_v2 = vld [vmem:[#allocation6 + $0x28] sm:$0xff]  ;;  %v899_v3 = vld [vmem:[#allocation6 + $0x20] sm:$0xff]  ;;  %v898_v4 = vld [vmem:[#allocation6 + $0x18] sm:$0xff]  ;;  %s916_s4 = smul.u32 208, %s1160_s15  ;;  %s1102_s10 = scalar_lea.hbm %s1423_s3, 416 }
  0x27   : > { %486 = vmatpush.bf16.msra.mxu0 %v902_v0  ;;  %917 = vmatpush.bf16.msra.mxu1 %v902_v0  ;;  %v897_v5 = vld [vmem:[#allocation6 + $0x10] sm:$0xff]  ;;  %v896_v6 = vld [vmem:[#allocation6 + $0x8] sm:$0xff]  ;;  %v895_v7 = vld [vmem:[#allocation6] sm:$0xff]  ;;  %s1329_s30 = scalar_lea.vmem [#allocation8], %s943_s20 }
  0x28   : > { %v909_v8 = vld [vmem:[%s1298_s18 + $0x30] sm:$0xff]  ;;  %v903_v10 = vld [vmem:[%s1298_s18] sm:$0xff]  ;;  %v906_v11 = vld [vmem:[%s1298_s18 + $0x18] sm:$0xff]  ;;  %s680_s24 = scalar_lea.hbm %s1423_s3, %s916_s4  ;;  %s681_s25 = sshll.u32 %s1329_s30, 4  ;;  %s682_s25 = int_to_ptr.vmem [resolvable:$true] %s681_s25 }
  0x29   : > { %v913_v9 = vld [vmem:[%s1298_s18 + $0x50] sm:$0xff]  ;;  %v910_v12 = vld [vmem:[%s1298_s18 + $0x38] sm:$0xff]  ;;  %v904_v14 = vld [vmem:[%s1298_s18 + $0x8] sm:$0xff]  ;;  %s683_s26 = sshll.u32 %s680_s24, 4  ;;  %s684_s26 = int_to_ptr.hbm [resolvable:$true] %s683_s26 }
  0x2a   : > { %921 = vmatpush.bf16.msra.mxu2 %v901_v1  ;;  %922 = vmatpush.bf16.msra.mxu3 %v901_v1  ;;  %v914_v13 = vld [vmem:[%s1298_s18 + $0x58] sm:$0xff]  ;;  %v907_v15 = vld [vmem:[%s1298_s18 + $0x20] sm:$0xff]  ;;  %v905_v18 = vld [vmem:[%s1298_s18 + $0x10] sm:$0xff]  ;;  %s1096_s21 = sshra.s32 %s684_s26, 4  ;;  %s1097_s21 = int_to_ptr.hbm [resolvable:$true] %s1096_s21 }
  0x2b   : > { %487 = vmatpush.bf16.msra.mxu0 %v901_v1  ;;  %920 = vmatpush.bf16.msra.mxu1 %v901_v1  ;;  %v911_v16 = vld [vmem:[%s1298_s18 + $0x40] sm:$0xff]  ;;  %v908_v19 = vld [vmem:[%s1298_s18 + $0x28] sm:$0xff]  ;;  %s1098_s15 = scalar_lea.hbm %s1097_s21, 208  ;;  %p1103_p8 = scmp.lt.s32.totalorder %s1097_s21, %s1423_s3 }
  0x2c   : > { %v915_v17 = vld [vmem:[%s1298_s18 + $0x60] sm:$0xff]  ;;  %v912_v20 = vld [vmem:[%s1298_s18 + $0x48] sm:$0xff]  ;;  %p1099_p1 = scmp.ne.s32.totalorder %s1097_s21, %s1098_s15  ;;  %p1104_p12 = scmp.lt.s32.totalorder %s1102_s10, %s1098_s15 }
  0x2d   : > { %v1325_v21 = vld [vmem:[%s1422_s2] ss:$0 sm:$0xff] }
  0x2e   : > { %924 = vmatpush.bf16.msra.mxu2 %v900_v2  ;;  %925 = vmatpush.bf16.msra.mxu3 %v900_v2  ;;  %p1100_p2 = pnand %p1099_p1, %p1273_p5  ;;  %p1105_p13 = por %p1104_p12, %p1103_p8 }
  0x2f   : > { %488 = vmatpush.bf16.msra.mxu0 %v900_v2  ;;  %923 = vmatpush.bf16.msra.mxu1 %v900_v2 }
  0x30   : > { %p1101_p4 = pneg %p1100_p2 }
  0x32   : > { %927 = vmatpush.bf16.msra.mxu2 %v899_v3  ;;  %928 = vmatpush.bf16.msra.mxu3 %v899_v3  ;;  %p1106_p0 = pnand %p1105_p13, %p1101_p4 }
  0x33   : > { %489 = vmatpush.bf16.msra.mxu0 %v899_v3  ;;  %926 = vmatpush.bf16.msra.mxu1 %v899_v3 }
  0x36   : > { %930 = vmatpush.bf16.msra.mxu2 %v898_v4  ;;  %931 = vmatpush.bf16.msra.mxu3 %v898_v4 }
  0x37   : > { %490 = vmatpush.bf16.msra.mxu0 %v898_v4  ;;  %929 = vmatpush.bf16.msra.mxu1 %v898_v4 }
  0x3a   : > { %933 = vmatpush.bf16.msra.mxu2 %v897_v5  ;;  %934 = vmatpush.bf16.msra.mxu3 %v897_v5 }
  0x3b   : > { %491 = vmatpush.bf16.msra.mxu0 %v897_v5  ;;  %932 = vmatpush.bf16.msra.mxu1 %v897_v5 }
  0x3e   : > { %936 = vmatpush.bf16.msra.mxu2 %v896_v6  ;;  %937 = vmatpush.bf16.msra.mxu3 %v896_v6 }
  0x3f   : > { %492 = vmatpush.bf16.msra.mxu0 %v896_v6  ;;  %935 = vmatpush.bf16.msra.mxu1 %v896_v6 }
  0x42   : > { %939 = vmatpush.bf16.msra.mxu2 %v895_v7  ;;  %940 = vmatpush.bf16.msra.mxu3 %v895_v7 }
  0x43   : > { %493 = vmatpush.bf16.msra.mxu0 %v895_v7  ;;  %938 = vmatpush.bf16.msra.mxu1 %v895_v7 }
  0x45   : > { %524 = vmatmul.bf16.vlgmr.msra.gmra.mxu2 %v909_v8  ;;  %544 = vmatmul.bf16.vlgmr.msra.gmra.mxu3 %v913_v9 }
  0x46   : > { %494 = vmatmul.bf16.vlgmr.msra.gmra.mxu0 %v903_v10  ;;  %509 = vmatmul.bf16.vlgmr.msra.gmra.mxu1 %v906_v11 }
  0x55   : > { %529 = vmatmul.bf16.gmra.mxu2 %v910_v12  ;;  %549 = vmatmul.bf16.gmra.mxu3 %v914_v13 }
  0x56   : > { %499 = vmatmul.bf16.gmra.mxu0 %v904_v14  ;;  %514 = vmatmul.bf16.gmra.mxu1 %v907_v15 }
  0x65   : > { %534 = vmatmul.bf16.gmra.mxu2 %v911_v16  ;;  %554 = vmatmul.bf16.gmra.mxu3 %v915_v17 }
  0x66   : > { %504 = vmatmul.bf16.gmra.mxu0 %v905_v18  ;;  %519 = vmatmul.bf16.gmra.mxu1 %v908_v19 }
  0x75   : > { %539 = vmatmul.bf16.gmra.mxu2 %v912_v20 }
  0xc3   : > { %v495_v22 = vpop.f32.mrf.mxu0  ;;  %v510_v23 = vpop.f32.mrf.mxu1 }
  0xc4   : > { %v560_v24 = vadd.f32 %v1325_v21, %v495_v22  ;;  %v566_v25 = vadd.f32 %v1325_v21, %v510_v23 }
  0xc6   : > { %641 = vst [vmem:[%s1329_s30] sm:$0xff] %v560_v24 }
  0xc7   : > { %647 = vst [vmem:[%s1329_s30 + $0x30] sm:$0xff] %v566_v25 }
  0xc8   : > { %v525_v26 = vpop.f32.mrf.mxu2  ;;  %v545_v27 = vpop.f32.mrf.mxu3 }
  0xc9   : > { %v572_v28 = vadd.f32 %v1325_v21, %v525_v26  ;;  %v580_v29 = vadd.f32 %v1325_v21, %v545_v27 }
  0xcb   : > { %653 = vst [vmem:[%s1329_s30 + $0x60] sm:$0xff] %v572_v28  ;;  %v497_v30 = vpop.f32.mrf.mxu0  ;;  %v512_v31 = vpop.f32.mrf.mxu1 }
  0xcc   : > { %661 = vst [vmem:[%s1329_s30 + $0xa0] sm:$0xff] %v580_v29  ;;  %v561_v32 = vadd.f32 %v1325_v21, %v497_v30  ;;  %v567_v33 = vadd.f32 %v1325_v21, %v512_v31 }
  0xce   : > { %642 = vst [vmem:[%s1329_s30 + $0x8] sm:$0xff] %v561_v32 }
  0xcf   : > { %648 = vst [vmem:[%s1329_s30 + $0x38] sm:$0xff] %v567_v33 }
  0xd0   : > { %v527_v34 = vpop.f32.mrf.mxu2  ;;  %v547_v35 = vpop.f32.mrf.mxu3 }
  0xd1   : > { %v573_v36 = vadd.f32 %v1325_v21, %v527_v34  ;;  %v581_v37 = vadd.f32 %v1325_v21, %v547_v35 }
  0xd3   : > { %654 = vst [vmem:[%s1329_s30 + $0x68] sm:$0xff] %v573_v36  ;;  %v500_v38 = vpop.f32.mrf.mxu0  ;;  %v515_v39 = vpop.f32.mrf.mxu1 }
  0xd4   : > { %662 = vst [vmem:[%s1329_s30 + $0xa8] sm:$0xff] %v581_v37  ;;  %v562_v40 = vadd.f32 %v1325_v21, %v500_v38  ;;  %v568_v41 = vadd.f32 %v1325_v21, %v515_v39 }
  0xd6   : > { %643 = vst [vmem:[%s1329_s30 + $0x10] sm:$0xff] %v562_v40 }
  0xd7   : > { %649 = vst [vmem:[%s1329_s30 + $0x40] sm:$0xff] %v568_v41 }
  0xd8   : > { %v530_v42 = vpop.f32.mrf.mxu2  ;;  %v550_v43 = vpop.f32.mrf.mxu3 }
  0xd9   : > { %v574_v44 = vadd.f32 %v1325_v21, %v530_v42  ;;  %v582_v45 = vadd.f32 %v1325_v21, %v550_v43 }
  0xdb   : > { %655 = vst [vmem:[%s1329_s30 + $0x70] sm:$0xff] %v574_v44  ;;  %v502_v46 = vpop.f32.mrf.mxu0  ;;  %v517_v47 = vpop.f32.mrf.mxu1 }
  0xdc   : > { %663 = vst [vmem:[%s1329_s30 + $0xb0] sm:$0xff] %v582_v45  ;;  %v563_v48 = vadd.f32 %v1325_v21, %v502_v46  ;;  %v569_v49 = vadd.f32 %v1325_v21, %v517_v47 }
  0xde   : > { %644 = vst [vmem:[%s1329_s30 + $0x18] sm:$0xff] %v563_v48 }
  0xdf   : > { %650 = vst [vmem:[%s1329_s30 + $0x48] sm:$0xff] %v569_v49 }
  0xe0   : > { %v532_v50 = vpop.f32.mrf.mxu2  ;;  %v552_v51 = vpop.f32.mrf.mxu3 }
  0xe1   : > { %v575_v52 = vadd.f32 %v1325_v21, %v532_v50  ;;  %v583_v53 = vadd.f32 %v1325_v21, %v552_v51 }
  0xe3   : > { %656 = vst [vmem:[%s1329_s30 + $0x78] sm:$0xff] %v575_v52  ;;  %v505_v54 = vpop.f32.mrf.mxu0  ;;  %v520_v55 = vpop.f32.mrf.mxu1 }
  0xe4   : > { %664 = vst [vmem:[%s1329_s30 + $0xb8] sm:$0xff] %v583_v53  ;;  %v564_v56 = vadd.f32 %v1325_v21, %v505_v54  ;;  %v570_v57 = vadd.f32 %v1325_v21, %v520_v55 }
  0xe6   : > { %645 = vst [vmem:[%s1329_s30 + $0x20] sm:$0xff] %v564_v56 }
  0xe7   : > { %651 = vst [vmem:[%s1329_s30 + $0x50] sm:$0xff] %v570_v57 }
  0xe8   : > { %v535_v58 = vpop.f32.mrf.mxu2  ;;  %v555_v59 = vpop.f32.mrf.mxu3 }
  0xe9   : > { %v576_v60 = vadd.f32 %v1325_v21, %v535_v58  ;;  %v584_v61 = vadd.f32 %v1325_v21, %v555_v59 }
  0xeb   : > { %657 = vst [vmem:[%s1329_s30 + $0x80] sm:$0xff] %v576_v60  ;;  %v507_v62 = vpop.f32.mrf.mxu0  ;;  %v522_v63 = vpop.f32.mrf.mxu1 }
  0xec   : > { %665 = vst [vmem:[%s1329_s30 + $0xc0] sm:$0xff] %v584_v61  ;;  %v565_v0 = vadd.f32 %v1325_v21, %v507_v62  ;;  %v571_v1 = vadd.f32 %v1325_v21, %v522_v63 }
  0xee   : > { %646 = vst [vmem:[%s1329_s30 + $0x28] sm:$0xff] %v565_v0 }
  0xef   : > { %652 = vst [vmem:[%s1329_s30 + $0x58] sm:$0xff] %v571_v1 }
  0xf0   : > { %v537_v2 = vpop.f32.mrf.mxu2  ;;  %v557_v3 = vpop.f32.mrf.mxu3 }
  0xf1   : > { %v577_v4 = vadd.f32 %v1325_v21, %v537_v2  ;;  %v585_v5 = vadd.f32 %v1325_v21, %v557_v3 }
  0xf3   : > { %658 = vst [vmem:[%s1329_s30 + $0x88] sm:$0xff] %v577_v4 }
  0xf4   : > { %666 = vst [vmem:[%s1329_s30 + $0xc8] sm:$0xff] %v585_v5 }
  0xf8   : > { %v540_v6 = vpop.f32.mrf.mxu2 }
  0xf9   : > { %v578_v7 = vadd.f32 %v1325_v21, %v540_v6 }
  0xfb   : > { %659 = vst [vmem:[%s1329_s30 + $0x90] sm:$0xff] %v578_v7 }
 0x100   : > { %v542_v8 = vpop.f32.mrf.mxu2 }
 0x101   : > { %v579_v9 = vadd.f32 %v1325_v21, %v542_v8 }
 0x103   : > { %660 = vst [vmem:[%s1329_s30 + $0x98] sm:$0xff] %v579_v9 }
 0x104   : > { %1109 = shalt.err (!%p1106_p0)
}
 0x105   : > { %s1173_s6 = smov 128   ;;  %s1174_s22 = smov 8  }
 0x106   : > { %950 = dma.vmem_to_hbm [thread:$0]  (%p1273_p5), %s682_s25, 3328, %s684_s26, %s668_s28, %s1173_s6, %s1173_s6, %s1174_s22  }
 0x107 PF: > { %s698_s27 = sand.u32 1, %s1148_s12   ;;  %p961_p3 = pnand %p803_p11, %p1244_p6 }
 0x108   : > { %s699_s30 = scalar_lea.sflag [#allocation5], %s698_s27 }
 0x109   : > { %p962_p7 = pneg %p961_p3 }
 0x10b   : > { %1143 = dma.done.wait (%p962_p7), %s699_s30, 3328  }
 0x10c   : > { %1145 = vsyncadd (%p962_p7), %s699_s30, 4294963968  ;;  %s20_s17 = sadd.s32 1, %s1168_s17   ;;  %s1430_s12 = smov %s1152_s13 }
 0x10d   : > { %p17_p9 = scmp.ge.s32.totalorder %s20_s17, 4   ;;  %s1431_s13 = smov %s1156_s14 }
 0x10e   : > { %s1432_s14 = smov %s1282_s11  ;;  %s1433_s15 = smov %s1164_s16 }
 0x10f   : > { %s1434_s16 = smov %s1436_s5  ;;  %19 = sbr.rel (!%p17_p9) target bundleno = 7 (0x7), region = 94 }
 0x114   :  { %705 = vsyncpa [#allocation4], 1 }
 0x115   :  { %707 = vsyncpa [#allocation4 + $0x1], 1 }
 0x116   :  { %708 = vsyncpa [#allocation7], 1 }
 0x117   :  { %709 = vsyncpa [#allocation5], 1 }
 0x118   :  { %711 = vsyncpa [#allocation5 + $0x1], 1 }

</bundles_post_ra>
